<compile_context>
chip_gen: v5e
topology: v5e:2x2
jax: 0.10.0
libtpu: 0.0.40
codegen_flags: <defaults>
</compile_context>

<pallas_src>
import functools

import jax
import jax.numpy as jnp
from jax import lax
from jax.experimental import pallas as pl
from jax.experimental.pallas import tpu as pltpu

NEG_INF = -1e30  # large finite negative: safe for exp() and avoids inf-inf NaNs


def _round_up(n, m):
    return (n + m - 1) // m * m


def _flash_attn_kernel(q_ref, kT_ref, v_ref, o_ref, m_sc, l_sc, acc_sc, *, tq, tk):
    """One (batch, q_block, kv_block) grid step of causal flash attention.

    q_ref  : (1, TQ, Hp)  bf16   pre-scaled query projection block
    kT_ref : (1, Hp, TK)  bf16   key projection block, pre-transposed
    v_ref  : (1, TK, Hp)  bf16   value projection block
    o_ref  : (1, TQ, Hp)  bf16
    m_sc   : (TQ, 1)      f32    running row max
    l_sc   : (TQ, 1)      f32    running row sum
    acc_sc : (TQ, Hp)     f32    running output accumulator
    """
    qi = pl.program_id(1)
    ki = pl.program_id(2)

    @pl.when(ki == 0)
    def _init():
        m_sc[...] = jnp.full_like(m_sc, NEG_INF)
        l_sc[...] = jnp.zeros_like(l_sc)
        acc_sc[...] = jnp.zeros_like(acc_sc)

    # Causal: kv blocks strictly above the diagonal contribute nothing -> skip.
    @pl.when(ki <= qi)
    def _compute():
        # s = q @ k^T as a plain (TQ,Hp)@(Hp,TK) contraction; K arrives
        # pre-transposed so no per-step XLU transpose is needed.
        s = jnp.dot(q_ref[0], kT_ref[0], preferred_element_type=jnp.float32)

        def _update(s_blk):
            m_prev = m_sc[...]
            m_new = jnp.maximum(m_prev, jnp.max(s_blk, axis=-1, keepdims=True))
            alpha = jnp.exp(m_prev - m_new)
            p = jnp.exp(s_blk - m_new)
            l_sc[...] = alpha * l_sc[...] + jnp.sum(p, axis=-1, keepdims=True)
            acc_sc[...] = alpha * acc_sc[...] + jnp.dot(
                p.astype(jnp.bfloat16), v_ref[0], preferred_element_type=jnp.float32)
            m_sc[...] = m_new

        @pl.when(ki < qi)
        def _off_diag():
            _update(s)  # fully visible block: no mask needed

        @pl.when(ki == qi)
        def _diag_and_finalize():
            # tq == tk, so block offsets cancel and local indices suffice.
            row = lax.broadcasted_iota(jnp.int32, (tq, tk), 0)
            col = lax.broadcasted_iota(jnp.int32, (tq, tk), 1)
            _update(jnp.where(col <= row, s, NEG_INF))
            # Finalize once per q block: EUP reciprocal on (TQ,1) applied to
            # the (TQ,Hp) accumulator, stored as bf16 (halves HBM writeback).
            inv_l = pl.reciprocal(l_sc[...], approx=True)
            o_ref[0] = (acc_sc[...] * inv_l).astype(o_ref.dtype)


def _default_block_q():
    """256 tiles for 256x256-MXU parts (v6e/v7x); 128 for 128x128-MXU parts."""
    try:
        kind = jax.devices()[0].device_kind.lower()
    except Exception:
        return 256
    for tag in ("v2", "v3", "v4", "v5"):
        if tag in kind:
            return 128
    return 256


def self_attention_head(x, w_key, w_query, w_value, *, block_q=None):
    """x: (B, T, C) f32; w_*: (C, H) f32  ->  (B, T, H) x.dtype (eval-mode forward)."""
    B, T, C = x.shape
    H = w_key.shape[1]
    scale = float(C) ** -0.5  # matches `* C ** (-0.5)` in the module (intentional)

    if block_q is None:
        block_q = _default_block_q()

    # Tile sizes: tq == tk (needed for the local diagonal mask).  bf16 packs
    # 16 rows per vreg, so short sequences round to a multiple of 16.
    tq = tk = min(block_q, _round_up(T, 16))
    t_pad = _round_up(T, tq)
    h_pad = _round_up(H, 128)  # lane-dense stores / full MXU result columns

    # --- Hoisted projections: once per (B, T), not once per (q-block, kv-block). ---
    x_p = x
    if t_pad != T:
        x_p = jnp.pad(x_p, ((0, 0), (0, t_pad - T), (0, 0)))
    # Single fused matmul x @ [Wq*scale | Wk | Wv] in f32; scale folded into Wq.
    w_cat = jnp.concatenate([w_query * scale, w_key, w_value], axis=1)   # (C, 3H)
    qkv = jnp.einsum("btc,ch->bth", x_p, w_cat)                          # (B, t_pad, 3H) f32
    q, k, v = jnp.split(qkv, 3, axis=-1)
    if h_pad != H:
        pad_h = ((0, 0), (0, 0), (0, h_pad - H))
        q = jnp.pad(q, pad_h)
        k = jnp.pad(k, pad_h)
        v = jnp.pad(v, pad_h)
    q = q.astype(jnp.bfloat16)                            # (B, t_pad, h_pad)
    kT = jnp.swapaxes(k, -1, -2).astype(jnp.bfloat16)     # (B, h_pad, t_pad)
    v = v.astype(jnp.bfloat16)                            # (B, t_pad, h_pad)

    nq = t_pad // tq
    nk = t_pad // tk

    kernel = functools.partial(_flash_attn_kernel, tq=tq, tk=tk)

    # Clamp the kv block index for the skipped (ki > qi) steps so they re-use
    # the already-resident block and trigger no DMA.
    kT_idx = lambda b, qi, ki: (b, 0, jnp.minimum(ki, qi))
    v_idx = lambda b, qi, ki: (b, jnp.minimum(ki, qi), 0)

    grid_spec = pltpu.PrefetchScalarGridSpec(
        num_scalar_prefetch=0,
        grid=(B, nq, nk),
        in_specs=[
            pl.BlockSpec((1, tq, h_pad), lambda b, qi, ki: (b, qi, 0)),   # Q block
            pl.BlockSpec((1, h_pad, tk), kT_idx),                         # K^T block
            pl.BlockSpec((1, tk, h_pad), v_idx),                          # V block
        ],
        out_specs=pl.BlockSpec((1, tq, h_pad), lambda b, qi, ki: (b, qi, 0)),
        scratch_shapes=[
            pltpu.VMEM((tq, 1), jnp.float32),       # running max
            pltpu.VMEM((tq, 1), jnp.float32),       # running sum
            pltpu.VMEM((tq, h_pad), jnp.float32),   # output accumulator
        ],
    )

    out = pl.pallas_call(
        kernel,
        out_shape=jax.ShapeDtypeStruct((B, t_pad, h_pad), jnp.bfloat16),
        grid_spec=grid_spec,
        compiler_params=pltpu.CompilerParams(
            # batch & q-tile axes shard across TensorCores (v7x megacore);
            # kv axis is the sequential reduction axis and stays innermost.
            dimension_semantics=("parallel", "parallel", "arbitrary"),
        ),
    )(q, kT, v)

    return out[:, :T, :H].astype(x.dtype)


def _reference(x, w_key, w_query, w_value):
    """Pure-JAX reference matching the PyTorch forward (eval mode)."""
    B, T, C = x.shape
    k = x @ w_key
    q = x @ w_query
    v = x @ w_value
    scores = (q @ jnp.swapaxes(k, -1, -2)) * (C ** -0.5)
    mask = jnp.tril(jnp.ones((T, T), dtype=bool))
    scores = jnp.where(mask, scores, -jnp.inf)
    p = jax.nn.softmax(scores, axis=-1)
    return p @ v


if __name__ == "__main__":
    # Small shapes consistent with the module: B=2, T=8, C(embedding)=32, head_size=16
    B, T, C, H = 2, 8, 32, 16

    key = jax.random.PRNGKey(0)
    kx, kk, kq, kv = jax.random.split(key, 4)

    x = jax.random.normal(kx, (B, T, C), dtype=jnp.float32)
    # nn.Linear(C, H, bias=False).weight has shape (H, C); we store its transpose (C, H).
    w_key = jax.random.normal(kk, (C, H), dtype=jnp.float32) * (C ** -0.5)
    w_query = jax.random.normal(kq, (C, H), dtype=jnp.float32) * (C ** -0.5)
    w_value = jax.random.normal(kv, (C, H), dtype=jnp.float32) * (C ** -0.5)

    out = self_attention_head(x, w_key, w_query, w_value)
    out = jax.block_until_ready(out)

    ref = _reference(x, w_key, w_query, w_value)
    assert out.shape == (B, T, H)
    # bf16 MXU operands / bf16 output (f32 accumulation) -> loose-ish tolerance.
    assert jnp.allclose(out, ref, atol=5e-2, rtol=5e-2), (
        f"mismatch vs reference, max abs err = {jnp.max(jnp.abs(out - ref))}")

    print("KERNEL_OK")
</pallas_src>

<mosaic_0001>
module attributes {stable_mosaic.version = 11 : i64} {
  func.func @_flash_attn_kernel(%arg0: i32, %arg1: i32, %arg2: i32, %arg3: memref<1x16x128xbf16, #tpu.memory_space<vmem>>, %arg4: memref<1x128x16xbf16, #tpu.memory_space<vmem>>, %arg5: memref<1x16x128xbf16, #tpu.memory_space<vmem>>, %arg6: memref<1x16x128xbf16, #tpu.memory_space<vmem>>, %arg7: memref<16x1xf32, #tpu.memory_space<vmem>>, %arg8: memref<16x1xf32, #tpu.memory_space<vmem>>, %arg9: memref<16x128xf32, #tpu.memory_space<vmem>>) attributes {dimension_semantics = [#tpu.dimension_semantics<parallel>, #tpu.dimension_semantics<parallel>, #tpu.dimension_semantics<arbitrary>], iteration_bounds = array<i64: 2, 1, 1>, scalar_prefetch = 0 : i64, scratch_operands = 3 : i64, tpu.core_type = #tpu.core_type<tc>, window_params = [{transform_indices = @transform_0, window_bounds = array<i64: 1, 16, 128>}, {transform_indices = @transform_1, window_bounds = array<i64: 1, 128, 16>}, {transform_indices = @transform_2, window_bounds = array<i64: 1, 16, 128>}, {transform_indices = @transform_3, window_bounds = array<i64: 1, 16, 128>}]} {
    %c0_i32 = arith.constant 0 : i32
    %0 = arith.cmpi eq, %arg2, %c0_i32 : i32
    %1 = arith.extui %0 : i1 to i32
    %c0_i32_0 = arith.constant 0 : i32
    %2 = arith.cmpi ne, %1, %c0_i32_0 : i32
    scf.if %2 {
      %cst = arith.constant -1.000000e+30 : f32
      %6 = vector.broadcast %cst : f32 to vector<16x1xf32>
      %c0 = arith.constant 0 : index
      %c0_2 = arith.constant 0 : index
      %7 = vector.load %arg7[%c0, %c0_2] : memref<16x1xf32, #tpu.memory_space<vmem>>, vector<16x1xf32>
      tpu.vector_store %arg7[%c0, %c0_2], %6 {strides = array<i32>} : memref<16x1xf32, #tpu.memory_space<vmem>>, vector<16x1xf32>,
      %cst_3 = arith.constant 0.000000e+00 : f32
      %8 = vector.broadcast %cst_3 : f32 to vector<16x1xf32>
      %c0_4 = arith.constant 0 : index
      %c0_5 = arith.constant 0 : index
      %9 = vector.load %arg8[%c0_4, %c0_5] : memref<16x1xf32, #tpu.memory_space<vmem>>, vector<16x1xf32>
      tpu.vector_store %arg8[%c0_4, %c0_5], %8 {strides = array<i32>} : memref<16x1xf32, #tpu.memory_space<vmem>>, vector<16x1xf32>,
      %cst_6 = arith.constant 0.000000e+00 : f32
      %10 = vector.broadcast %cst_6 : f32 to vector<16x128xf32>
      %c0_7 = arith.constant 0 : index
      %c0_8 = arith.constant 0 : index
      %11 = vector.load %arg9[%c0_7, %c0_8] : memref<16x128xf32, #tpu.memory_space<vmem>>, vector<16x128xf32>
      tpu.vector_store %arg9[%c0_7, %c0_8], %10 {strides = array<i32>} : memref<16x128xf32, #tpu.memory_space<vmem>>, vector<16x128xf32>,
    } else {
    }
    %3 = arith.cmpi sle, %arg2, %arg1 : i32
    %4 = arith.extui %3 : i1 to i32
    %c0_i32_1 = arith.constant 0 : i32
    %5 = arith.cmpi ne, %4, %c0_i32_1 : i32
    scf.if %5 {
      %c0 = arith.constant 0 : index
      %c0_2 = arith.constant 0 : index
      %c0_3 = arith.constant 0 : index
      %6 = vector.load %arg3[%c0, %c0_2, %c0_3] : memref<1x16x128xbf16, #tpu.memory_space<vmem>>, vector<1x16x128xbf16>
      %7 = vector.shape_cast %6 : vector<1x16x128xbf16> to vector<16x128xbf16>
      %c0_4 = arith.constant 0 : index
      %c0_5 = arith.constant 0 : index
      %c0_6 = arith.constant 0 : index
      %8 = vector.load %arg4[%c0_4, %c0_5, %c0_6] : memref<1x128x16xbf16, #tpu.memory_space<vmem>>, vector<1x128x16xbf16>
      %9 = vector.shape_cast %8 : vector<1x128x16xbf16> to vector<128x16xbf16>
      %cst = arith.constant dense<0.000000e+00> : vector<16x16xf32>
      %10 = tpu.matmul %7, %9, %cst {dimension_numbers = #tpu.dot_dimension_numbers<[1], [0], [0], [1], [0, 0, 1, 1], [], []>} : vector<16x128xbf16>, vector<128x16xbf16>, vector<16x16xf32> -> vector<16x16xf32>
      %11 = arith.cmpi slt, %arg2, %arg1 : i32
      %12 = arith.extui %11 : i1 to i32
      %c0_i32_7 = arith.constant 0 : i32
      %13 = arith.cmpi ne, %12, %c0_i32_7 : i32
      scf.if %13 {
        %c0_9 = arith.constant 0 : index
        %c0_10 = arith.constant 0 : index
        %17 = vector.load %arg7[%c0_9, %c0_10] : memref<16x1xf32, #tpu.memory_space<vmem>>, vector<16x1xf32>
        %cst_11 = arith.constant dense<0xFF800000> : vector<16xf32>
        %18 = vector.multi_reduction <maximumf>, %10, %cst_11 [1] : vector<16x16xf32> to vector<16xf32>
        %19 = vector.shape_cast %18 : vector<16xf32> to vector<16x1xf32>
        %20 = arith.maximumf %17, %19 : vector<16x1xf32>
        %21 = arith.subf %17, %20 : vector<16x1xf32>
        %22 = math.exp %21 : vector<16x1xf32>
        %23 = vector.broadcast %20 : vector<16x1xf32> to vector<16x16xf32>
        %24 = arith.subf %10, %23 : vector<16x16xf32>
        %25 = math.exp %24 : vector<16x16xf32>
        %c0_12 = arith.constant 0 : index
        %c0_13 = arith.constant 0 : index
        %26 = vector.load %arg8[%c0_12, %c0_13] : memref<16x1xf32, #tpu.memory_space<vmem>>, vector<16x1xf32>
        %27 = arith.mulf %22, %26 : vector<16x1xf32>
        %cst_14 = arith.constant dense<0.000000e+00> : vector<16xf32>
        %28 = vector.multi_reduction <add>, %25, %cst_14 [1] : vector<16x16xf32> to vector<16xf32>
        %29 = vector.shape_cast %28 : vector<16xf32> to vector<16x1xf32>
        %30 = arith.addf %27, %29 : vector<16x1xf32>
        %c0_15 = arith.constant 0 : index
        %c0_16 = arith.constant 0 : index
        %31 = vector.load %arg8[%c0_15, %c0_16] : memref<16x1xf32, #tpu.memory_space<vmem>>, vector<16x1xf32>
        tpu.vector_store %arg8[%c0_15, %c0_16], %30 {strides = array<i32>} : memref<16x1xf32, #tpu.memory_space<vmem>>, vector<16x1xf32>,
        %c0_17 = arith.constant 0 : index
        %c0_18 = arith.constant 0 : index
        %32 = vector.load %arg9[%c0_17, %c0_18] : memref<16x128xf32, #tpu.memory_space<vmem>>, vector<16x128xf32>
        %33 = vector.broadcast %22 : vector<16x1xf32> to vector<16x128xf32>
        %34 = arith.mulf %33, %32 : vector<16x128xf32>
        %35 = arith.truncf %25 : vector<16x16xf32> to vector<16x16xbf16>
        %c0_19 = arith.constant 0 : index
        %c0_20 = arith.constant 0 : index
        %c0_21 = arith.constant 0 : index
        %36 = vector.load %arg5[%c0_19, %c0_20, %c0_21] : memref<1x16x128xbf16, #tpu.memory_space<vmem>>, vector<1x16x128xbf16>
        %37 = vector.shape_cast %36 : vector<1x16x128xbf16> to vector<16x128xbf16>
        %cst_22 = arith.constant dense<0.000000e+00> : vector<16x128xf32>
        %38 = tpu.matmul %35, %37, %cst_22 {dimension_numbers = #tpu.dot_dimension_numbers<[1], [0], [0], [1], [0, 0, 1, 1], [], []>} : vector<16x16xbf16>, vector<16x128xbf16>, vector<16x128xf32> -> vector<16x128xf32>
        %39 = arith.addf %34, %38 : vector<16x128xf32>
        %c0_23 = arith.constant 0 : index
        %c0_24 = arith.constant 0 : index
        %40 = vector.load %arg9[%c0_23, %c0_24] : memref<16x128xf32, #tpu.memory_space<vmem>>, vector<16x128xf32>
        tpu.vector_store %arg9[%c0_23, %c0_24], %39 {strides = array<i32>} : memref<16x128xf32, #tpu.memory_space<vmem>>, vector<16x128xf32>,
        %c0_25 = arith.constant 0 : index
        %c0_26 = arith.constant 0 : index
        %41 = vector.load %arg7[%c0_25, %c0_26] : memref<16x1xf32, #tpu.memory_space<vmem>>, vector<16x1xf32>
        tpu.vector_store %arg7[%c0_25, %c0_26], %20 {strides = array<i32>} : memref<16x1xf32, #tpu.memory_space<vmem>>, vector<16x1xf32>,
      } else {
      }
      %14 = arith.cmpi eq, %arg2, %arg1 : i32
      %15 = arith.extui %14 : i1 to i32
      %c0_i32_8 = arith.constant 0 : i32
      %16 = arith.cmpi ne, %15, %c0_i32_8 : i32
      scf.if %16 {
        %17 = tpu.iota {dimensions = array<i32: 0>} : vector<16x16xi32>
        %18 = tpu.iota {dimensions = array<i32: 1>} : vector<16x16xi32>
        %19 = arith.cmpi sle, %18, %17 : vector<16x16xi32>
        %cst_9 = arith.constant -1.000000e+30 : f32
        %20 = vector.broadcast %cst_9 : f32 to vector<16x16xf32>
        %21 = arith.select %19, %10, %20 : vector<16x16xi1>, vector<16x16xf32>
        %c0_10 = arith.constant 0 : index
        %c0_11 = arith.constant 0 : index
        %22 = vector.load %arg7[%c0_10, %c0_11] : memref<16x1xf32, #tpu.memory_space<vmem>>, vector<16x1xf32>
        %cst_12 = arith.constant dense<0xFF800000> : vector<16xf32>
        %23 = vector.multi_reduction <maximumf>, %21, %cst_12 [1] : vector<16x16xf32> to vector<16xf32>
        %24 = vector.shape_cast %23 : vector<16xf32> to vector<16x1xf32>
        %25 = arith.maximumf %22, %24 : vector<16x1xf32>
        %26 = arith.subf %22, %25 : vector<16x1xf32>
        %27 = math.exp %26 : vector<16x1xf32>
        %28 = vector.broadcast %25 : vector<16x1xf32> to vector<16x16xf32>
        %29 = arith.subf %21, %28 : vector<16x16xf32>
        %30 = math.exp %29 : vector<16x16xf32>
        %c0_13 = arith.constant 0 : index
        %c0_14 = arith.constant 0 : index
        %31 = vector.load %arg8[%c0_13, %c0_14] : memref<16x1xf32, #tpu.memory_space<vmem>>, vector<16x1xf32>
        %32 = arith.mulf %27, %31 : vector<16x1xf32>
        %cst_15 = arith.constant dense<0.000000e+00> : vector<16xf32>
        %33 = vector.multi_reduction <add>, %30, %cst_15 [1] : vector<16x16xf32> to vector<16xf32>
        %34 = vector.shape_cast %33 : vector<16xf32> to vector<16x1xf32>
        %35 = arith.addf %32, %34 : vector<16x1xf32>
        %c0_16 = arith.constant 0 : index
        %c0_17 = arith.constant 0 : index
        %36 = vector.load %arg8[%c0_16, %c0_17] : memref<16x1xf32, #tpu.memory_space<vmem>>, vector<16x1xf32>
        tpu.vector_store %arg8[%c0_16, %c0_17], %35 {strides = array<i32>} : memref<16x1xf32, #tpu.memory_space<vmem>>, vector<16x1xf32>,
        %c0_18 = arith.constant 0 : index
        %c0_19 = arith.constant 0 : index
        %37 = vector.load %arg9[%c0_18, %c0_19] : memref<16x128xf32, #tpu.memory_space<vmem>>, vector<16x128xf32>
        %38 = vector.broadcast %27 : vector<16x1xf32> to vector<16x128xf32>
        %39 = arith.mulf %38, %37 : vector<16x128xf32>
        %40 = arith.truncf %30 : vector<16x16xf32> to vector<16x16xbf16>
        %c0_20 = arith.constant 0 : index
        %c0_21 = arith.constant 0 : index
        %c0_22 = arith.constant 0 : index
        %41 = vector.load %arg5[%c0_20, %c0_21, %c0_22] : memref<1x16x128xbf16, #tpu.memory_space<vmem>>, vector<1x16x128xbf16>
        %42 = vector.shape_cast %41 : vector<1x16x128xbf16> to vector<16x128xbf16>
        %cst_23 = arith.constant dense<0.000000e+00> : vector<16x128xf32>
        %43 = tpu.matmul %40, %42, %cst_23 {dimension_numbers = #tpu.dot_dimension_numbers<[1], [0], [0], [1], [0, 0, 1, 1], [], []>} : vector<16x16xbf16>, vector<16x128xbf16>, vector<16x128xf32> -> vector<16x128xf32>
        %44 = arith.addf %39, %43 : vector<16x128xf32>
        %c0_24 = arith.constant 0 : index
        %c0_25 = arith.constant 0 : index
        %45 = vector.load %arg9[%c0_24, %c0_25] : memref<16x128xf32, #tpu.memory_space<vmem>>, vector<16x128xf32>
        tpu.vector_store %arg9[%c0_24, %c0_25], %44 {strides = array<i32>} : memref<16x128xf32, #tpu.memory_space<vmem>>, vector<16x128xf32>,
        %c0_26 = arith.constant 0 : index
        %c0_27 = arith.constant 0 : index
        %46 = vector.load %arg7[%c0_26, %c0_27] : memref<16x1xf32, #tpu.memory_space<vmem>>, vector<16x1xf32>
        tpu.vector_store %arg7[%c0_26, %c0_27], %25 {strides = array<i32>} : memref<16x1xf32, #tpu.memory_space<vmem>>, vector<16x1xf32>,
        %c0_28 = arith.constant 0 : index
        %c0_29 = arith.constant 0 : index
        %47 = vector.load %arg8[%c0_28, %c0_29] : memref<16x1xf32, #tpu.memory_space<vmem>>, vector<16x1xf32>
        %48 = tpu.reciprocal %47 {approx = true} : vector<16x1xf32> -> vector<16x1xf32>
        %c0_30 = arith.constant 0 : index
        %c0_31 = arith.constant 0 : index
        %49 = vector.load %arg9[%c0_30, %c0_31] : memref<16x128xf32, #tpu.memory_space<vmem>>, vector<16x128xf32>
        %50 = vector.broadcast %48 : vector<16x1xf32> to vector<16x128xf32>
        %51 = arith.mulf %49, %50 : vector<16x128xf32>
        %52 = arith.truncf %51 : vector<16x128xf32> to vector<16x128xbf16>
        %c0_32 = arith.constant 0 : index
        %c0_33 = arith.constant 0 : index
        %c0_34 = arith.constant 0 : index
        %53 = vector.load %arg6[%c0_32, %c0_33, %c0_34] : memref<1x16x128xbf16, #tpu.memory_space<vmem>>, vector<1x16x128xbf16>
        %54 = vector.shape_cast %53 : vector<1x16x128xbf16> to vector<16x128xbf16>
        %55 = vector.shape_cast %52 : vector<16x128xbf16> to vector<1x16x128xbf16>
        tpu.vector_store %arg6[%c0_32, %c0_33, %c0_34], %55 {strides = array<i32>} : memref<1x16x128xbf16, #tpu.memory_space<vmem>>, vector<1x16x128xbf16>,
      } else {
      }
    } else {
    }
    return
  }
  func.func @transform_0(%arg0: i32, %arg1: i32, %arg2: i32) -> (i32, i32, i32) {
    %c0_i32 = arith.constant 0 : i32
    %c0_i32_0 = arith.constant 0 : i32
    return %arg0, %arg1, %c0_i32 : i32, i32, i32
  }
  func.func @transform_1(%arg0: i32, %arg1: i32, %arg2: i32) -> (i32, i32, i32) {
    %0 = arith.minsi %arg2, %arg1 : i32
    %c0_i32 = arith.constant 0 : i32
    %c0_i32_0 = arith.constant 0 : i32
    return %arg0, %c0_i32, %0 : i32, i32, i32
  }
  func.func @transform_2(%arg0: i32, %arg1: i32, %arg2: i32) -> (i32, i32, i32) {
    %0 = arith.minsi %arg2, %arg1 : i32
    %c0_i32 = arith.constant 0 : i32
    %c0_i32_0 = arith.constant 0 : i32
    return %arg0, %0, %c0_i32 : i32, i32, i32
  }
  func.func @transform_3(%arg0: i32, %arg1: i32, %arg2: i32) -> (i32, i32, i32) {
    %c0_i32 = arith.constant 0 : i32
    %c0_i32_0 = arith.constant 0 : i32
    return %arg0, %arg1, %c0_i32 : i32, i32, i32
  }
}

</mosaic_0001>

<bundles_post_ra>
// kernel: tpu_custom_call.1
= control target key start
LH: loop header
LB: loop body
LE: loop exit
PB: predicated region body
PF: predicated region fallthrough
CT: control target
= control target key end

     0   :  { %8 = vsyncpa [#allocation6], 0  ;;  %s1157_s0 = inlined_call_operand.vmem [shape: bf16[2,16,128], index: 0, kind: input, shape index: {}]   ;;  %s1158_s1 = inlined_call_operand.vmem [shape: bf16[2,128,16], index: 1, kind: input, shape index: {}]   ;;  %s1159_s2 = inlined_call_operand.vmem [shape: bf16[2,16,128], index: 2, kind: input, shape index: {}]   ;;  %s1160_s3 = inlined_call_operand.hbm [shape: bf16[2,16,128], index: 3, kind: output, shape index: {}]  }
   0x1   :  { %10 = vsyncpa [#allocation6 + $0x1], 0  ;;  %s1030_s12 = smov 0   ;;  %s1032_s13 = smov 0  }
   0x2   :  { %s1034_s14 = smov 0   ;;  %s1036_s15 = smov 0  }
   0x3   :  { %s1038_s16 = smov 0   ;;  %s1040_s17 = smov 0  }
   0x4 LB: > { %s767_s18 = sadd.s32 4294967295, %s1003_s17   ;;  %s768_s19 = sadd.s32 4294967294, %s1003_s17   ;;  %s1003_s17 = sphi %s1040_s17, %s16_s17   ;;  %s999_s16 = sphi %s1038_s16, %s1167_s16   ;;  %s995_s15 = sphi %s1036_s15, %s1166_s15   ;;  %s991_s14 = sphi %s1034_s14, %s1165_s14   ;;  %s987_s13 = sphi %s1032_s13, %s1164_s13   ;;  %s983_s12 = sphi %s1030_s12, %s1163_s12  }
   0x5   : > { %s35_s20 = sadd.s32 1, %s999_s16  ;;  %s136_s21 = sadd.s32 1, %s991_s14 }
   0x6   : > { %p37_p0 = scmp.ge.s32.totalorder %s35_s20, 2  ;;  %p146_p1 = scmp.ne.s32.totalorder %s991_s14, %s987_s13 }
   0x7   : > { %p147_p2 = scmp.eq.s32.totalorder %s767_s18, 1  ;;  %p152_p3 = scmp.ne.s32.totalorder %s987_s13, %s983_s12 }
   0x8   : > { %s1169_s20 = smov (%p37_p0, %s35_s20), 0  ;;  %p153_p5 = scmp.eq.s32.totalorder %s768_s19, 1 }
   0x9   : > { %p1070_p4 = por %p147_p2, %p146_p1  ;;  %s131_s23 = ssub.s32 %s999_s16, %s1169_s20 }
   0xa   : > { %p771_p6 = scmp.ge.s32.totalorder %s1003_s17, 1  ;;  %p134_p7 = scmp.eq.s32.totalorder %s131_s23, 0 }
   0xb   : > { %p1077_p8 = por %p153_p5, %p152_p3  ;;  %p216_p9 = scmp.lt.s32.totalorder %s1003_s17, 3 }
   0xc   : > { %s1083_s25 = scalar_select %p134_p7, %s991_s14, %s136_s21  }
   0xd   : > { %p217_p10 = pnand %p771_p6, %p216_p9 }
   0xe   : > { %p266_p11 = scmp.lt.s32.totalorder (!%p217_p10), %s995_s15, 1  ;;  %s262_s11 = sand.u32 (!%p217_p10), 1, %s987_s13  }
   0xf   : > { %220 = sbr.rel (%p217_p10) target bundleno = 693 (0x2b5), region = 32  ;;  %s772_s18 = sshll.u32 (!%p217_p10), %s262_s11, 3 }
  0x10   : > { %s844_s19 = sshll.u32 (!%p217_p10), %s995_s15, 3 }
  0x14   : > { %s1087_s26 = scalar_select %p266_p11, %s995_s15, 1  ;;  %vm307_vm0 = vcmask 7168   ;;  %v1005_v9 = vmov -1e+30   ;;  %v506_v10 = vlaneseq  ;;  %vm517_vm2 = vcmask 130048  }
  0x15   : > { %308 = vst.msk [vmem:[#allocation2] sm:$0xff] %vm307_vm0, %v1005_v9  ;;  %v1006_v20 = vmov 0   ;;  %v1007_v21 = vmov 0.0   ;;  %s632_s15 = scalar_lea.sflag [#allocation6], %s262_s11 }
  0x16   : > { %s831_s27 = sshll.u32 %s1087_s26, 6  ;;  %s830_s4 = sshll.u32 %s1087_s26, 3  ;;  %309 = vst.msk [vmem:[#allocation2 + $0x8] sm:$0xff] %vm307_vm0, %v1005_v9  ;;  %v507_v11 = vshrl.u32 %v506_v10, 7  ;;  %v510_v12 = vand.u32 127, %v506_v10  ;;  %910 = vset.pattern.permute.xlu1 %v1006_v20  ;;  %911 = vset.pattern.permute.xlu0 %v1006_v20 }
  0x17   : > { %s284_s30 = scalar_lea.vmem %s1158_s1, %s831_s27  ;;  %s273_s7 = scalar_lea.vmem %s1157_s0, %s830_s4  ;;  %912 = vset.pattern.permute.xlu2 %v1006_v20  ;;  %310 = vst.msk [vmem:[#allocation3] sm:$0xff] %vm307_vm0, %v1007_v21 }
  0x18   : > { %v841_v0 = vld [vmem:[%s284_s30 + $0x38] sm:$0xff]  ;;  %v840_v1 = vld [vmem:[%s284_s30 + $0x30] sm:$0xff]  ;;  %v839_v2 = vld [vmem:[%s284_s30 + $0x28] sm:$0xff]  ;;  %vm511_vm1 = vcmp.le.s32.totalorder %v510_v12, %v507_v11  ;;  %v508_v16 = vadd.s32 8, %v507_v11  ;;  %311 = vst.msk [vmem:[#allocation3 + $0x8] sm:$0xff] %vm307_vm0, %v1007_v21  ;;  %s297_s10 = scalar_lea.vmem %s1159_s2, %s830_s4  ;;  %s645_s26 = scalar_lea.hbm %s1160_s3, %s844_s19 }
  0x19   : > { %390 = vmatpush.bf16.msra.mxu0 %v841_v0  ;;  %v838_v3 = vld [vmem:[%s284_s30 + $0x20] sm:$0xff]  ;;  %v837_v4 = vld [vmem:[%s284_s30 + $0x18] sm:$0xff]  ;;  %v836_v5 = vld [vmem:[%s284_s30 + $0x10] sm:$0xff]  ;;  %s264_s27 = scalar_lea.vmem [#allocation5], %s772_s18  ;;  %s648_s29 = sshll.u32 %s645_s26, 4  ;;  %s649_s29 = int_to_ptr.hbm [resolvable:$true] %s648_s29 }
  0x1a   : > { %v835_v6 = vld [vmem:[%s284_s30 + $0x8] sm:$0xff]  ;;  %v834_v7 = vld [vmem:[%s284_s30] sm:$0xff]  ;;  %vm512_vm3 = vcmp.le.s32.totalorder %v510_v12, %v508_v16  ;;  %s1122_s28 = sshll.u32 %s264_s27, 4  ;;  %s939_s30 = sshra.s32 %s649_s29, 4  ;;  %s647_s28 = int_to_ptr.vmem [resolvable:$true] %s1122_s28  ;;  %s940_s30 = int_to_ptr.hbm [resolvable:$true] %s939_s30 }
  0x1b   : > { %v833_v8 = vld [vmem:[%s273_s7] sm:$0xff]  ;;  %s941_s4 = scalar_lea.hbm %s940_s30, 8  ;;  %s945_s7 = scalar_lea.hbm %s1160_s3, 16 }
  0x1c   : > { %v515_v22 = vld [vmem:[#allocation2] sm:$0xff]  ;;  %p942_p12 = scmp.ne.s32.totalorder %s940_s30, %s941_s4  ;;  %p946_p1 = scmp.lt.s32.totalorder %s940_s30, %s1160_s3 }
  0x1d   : > { %391 = vmatpush.bf16.msra.mxu0 %v840_v1  ;;  %v516_v27 = vld [vmem:[#allocation2 + $0x8] sm:$0xff]  ;;  %v843_v34 = vld [vmem:[%s297_s10] sm:$0xff]  ;;  %p947_p2 = scmp.lt.s32.totalorder %s945_s7, %s941_s4 }
  0x1e   : > { %596 = vmatpush.bf16.msra.mxu1 %v843_v34  ;;  %v548_v46 = vld [vmem:[#allocation3] sm:$0xff]  ;;  %p943_p13 = pnand %p942_p12, %p1070_p4 }
  0x1f   : > { %v549_v50 = vld [vmem:[#allocation3 + $0x8] sm:$0xff]  ;;  %p948_p3 = por %p947_p2, %p946_p1 }
  0x20   : > { %p944_p0 = pneg %p943_p13 }
  0x21   : > { %392 = vmatpush.bf16.msra.mxu0 %v839_v2 }
  0x22   : > { %p949_p5 = pnand %p948_p3, %p944_p0 }
  0x25   : > { %393 = vmatpush.bf16.msra.mxu0 %v838_v3 }
  0x29   : > { %394 = vmatpush.bf16.msra.mxu0 %v837_v4 }
  0x2d   : > { %395 = vmatpush.bf16.msra.mxu0 %v836_v5 }
  0x31   : > { %396 = vmatpush.bf16.msra.mxu0 %v835_v6 }
  0x35   : > { %397 = vmatpush.bf16.msra.mxu0 %v834_v7 }
  0x38   : > { %398 = vmatmul.bf16.vlgmr.msra.gmra.mxu0 %v833_v8 }
  0xb5   : > { %v399_v13 = vpop.f32.mrf.mxu0 }
  0xb6   : > { %v513_v14 = vsel %vm511_vm1, %v399_v13, -1e+30 }
  0xb7   : > { %v518_v15 = vsel %vm517_vm2, %v513_v14, -inf }
  0xb8   : > { %519 = vmax.xlane.f32.xlu0 %v518_v15 }
  0xbd   : > { %v401_v17 = vpop.f32.mrf.mxu0 }
  0xbe   : > { %v514_v18 = vsel %vm512_vm3, %v401_v17, -1e+30 }
  0xbf   : > { %v521_v19 = vsel %vm517_vm2, %v514_v18, -inf }
  0xc0   : > { %522 = vmax.xlane.f32.xlu0 %v521_v19 }
 0x12b   : > { %v520_v23 = vpop.xlane.xlu0 %519 }
 0x12c   : > { %v524_v24 = vmax.f32 %v515_v22, %v520_v23 }
 0x12e   : > { %v526_v25 = vsub.f32 %v515_v22, %v524_v24  ;;  %607 = vst.msk [vmem:[#allocation2] sm:$0xff] %vm307_vm0, %v524_v24  ;;  %534 = vperm.xlu1 %910, %v524_v24  }
 0x130   : > { %v528_v26 = vmul.f32 1.442695, %v526_v25 }
 0x132   : > { %913 = vpow2.f32 %v528_v26 }
 0x133   : > { %v523_v28 = vpop.xlane.xlu0 %522 }
 0x134   : > { %v525_v29 = vmax.f32 %v516_v27, %v523_v28 }
 0x136   : > { %v527_v30 = vsub.f32 %v516_v27, %v525_v29  ;;  %608 = vst.msk [vmem:[#allocation2 + $0x8] sm:$0xff] %vm307_vm0, %v525_v29  ;;  %539 = vperm.xlu1 %910, %v525_v29  }
 0x138   : > { %v914_v31 = vpop.eup %913  ;;  %v530_v32 = vmul.f32 1.442695, %v527_v30 }
 0x139   : > { %567 = vperm.xlu0 %911, %v914_v31   ;;  %v550_v47 = vmul.f32 %v914_v31, %v548_v46 }
 0x13a   : > { %915 = vpow2.f32 %v530_v32 }
 0x140   : > { %v916_v33 = vpop.eup %915 }
 0x141   : > { %572 = vperm.xlu1 %910, %v916_v33   ;;  %v551_v51 = vmul.f32 %v916_v33, %v549_v50 }
 0x1a0   : > { %v535_v35 = vpop.permute.xlu1 %534 }
 0x1a1   : > { %v542_v36 = vsub.f32 %v513_v14, %v535_v35 }
 0x1a3   : > { %v544_v37 = vmul.f32 1.442695, %v542_v36 }
 0x1a5   : > { %917 = vpow2.f32 %v544_v37 }
 0x1a8   : > { %v540_v38 = vpop.permute.xlu1 %539 }
 0x1a9   : > { %v543_v39 = vsub.f32 %v514_v18, %v540_v38 }
 0x1ab   : > { %v918_v40 = vpop.eup %917  ;;  %v546_v41 = vmul.f32 1.442695, %v543_v39  ;;  %v568_v60 = vpop.permute.xlu0 %567 }
 0x1ac   : > { %v552_v42 = vsel %vm517_vm2, %v918_v40, 0.0  ;;  %v575_v62 = vmul.f32 0.0, %v568_v60 }
 0x1ad   : > { %919 = vpow2.f32 %v546_v41  ;;  %553 = vadd.xlane.f32.xlu2 %v552_v42 }
 0x1b3   : > { %v920_v43 = vpop.eup %919  ;;  %v573_v59 = vpop.permute.xlu1 %572 }
 0x1b4   : > { %v555_v44 = vsel %vm517_vm2, %v920_v43, 0.0  ;;  %v577_v45 = vpack.c.bf16 %v920_v43, %v918_v40  ;;  %v576_v63 = vmul.f32 0.0, %v573_v59 }
 0x1b5   : > { %556 = vadd.xlane.f32.xlu2 %v555_v44 }
 0x1b6   : > { %824 = vmatmul.msk.bf16.vlgmr.msra.gmra.mxu1 %vm517_vm2, %v577_v45 }
 0x220   : > { %v554_v48 = vpop.xlane.xlu2 %553 }
 0x221   : > { %v558_v49 = vadd.f32 %v554_v48, %v550_v47 }
 0x223   : > { %561 = vst.msk [vmem:[#allocation3] sm:$0xff] %vm307_vm0, %v558_v49 }
 0x228   : > { %v557_v52 = vpop.xlane.xlu2 %556 }
 0x229   : > { %v559_v53 = vadd.f32 %v557_v52, %v551_v51 }
 0x22a   : > { %v609_v54 = vld [vmem:[#allocation3] sm:$0xff] }
 0x22b   : > { %562 = vst.msk [vmem:[#allocation3 + $0x8] sm:$0xff] %vm307_vm0, %v559_v53  ;;  %921 = vrcp.f32 %v609_v54 }
 0x231   : > { %v922_v55 = vpop.eup %921 }
 0x232   : > { %617 = vperm.xlu2 %912, %v922_v55   ;;  %v610_v56 = vld [vmem:[#allocation3 + $0x8] sm:$0xff] }
 0x233   : > { %923 = vrcp.f32 %v610_v56  ;;  %v598_v58 = vpop.f32.mrf.mxu1 }
 0x234   : > { %v603_v1 = vadd.f32 %v598_v58, %v575_v62 }
 0x239   : > { %v924_v57 = vpop.eup %923 }
 0x23a   : > { %622 = vperm.xlu1 %910, %v924_v57  }
 0x23b   : > { %v600_v61 = vpop.f32.mrf.mxu1 }
 0x23c   : > { %v604_v2 = vadd.f32 %v600_v61, %v576_v63 }
 0x28c   : > { %v618_v0 = vpop.permute.xlu2 %617 }
 0x28d   : > { %v625_v4 = vmul.f32 %v618_v0, %v603_v1 }
 0x2ac   : > { %v623_v3 = vpop.permute.xlu1 %622 }
 0x2ad   : > { %v626_v5 = vmul.f32 %v623_v3, %v604_v2 }
 0x2af   : > { %v848_v6 = vpack.c.bf16 %v626_v5, %v625_v4 }
 0x2b1   : > { %849 = vst [vmem:[%s264_s27] sm:$0xff] %v848_v6  }
 0x2b2   : > { %952 = shalt.err (!%p949_p5)
}
 0x2b3   : > { %s1008_s10 = smov 64   ;;  %s1009_s11 = smov 4  }
 0x2b4   : > { %850 = dma.vmem_to_hbm [thread:$0]  (%p1070_p4), %s647_s28, 128, %s649_s29, %s632_s15, %s1008_s10, %s1008_s10, %s1009_s11  }
 0x2b5 PF: > { %p856_p6 = scmp.ge.s32.totalorder %s1003_s17, 2  ;;  %s663_s18 = sand.u32 1, %s983_s12  }
 0x2b6   : > { %s664_s19 = scalar_lea.sflag [#allocation6], %s663_s18 }
 0x2b7   : > { %p853_p7 = pnand %p856_p6, %p1077_p8 }
 0x2b9   : > { %p854_p9 = pneg %p853_p7 }
 0x2bb   : > { %978 = dma.done.wait (%p854_p9), %s664_s19, 128  }
 0x2bc   : > { %980 = vsyncadd (%p854_p9), %s664_s19, 4294967168  ;;  %s16_s17 = sadd.s32 1, %s1003_s17   ;;  %s1163_s12 = smov %s987_s13 }
 0x2bd   : > { %p13_p10 = scmp.ge.s32.totalorder %s16_s17, 4   ;;  %s1164_s13 = smov %s991_s14 }
 0x2be   : > { %s1165_s14 = smov %s1083_s25  ;;  %s1166_s15 = smov %s999_s16 }
 0x2bf   : > { %s1167_s16 = smov %s1169_s20  ;;  %15 = sbr.rel (!%p13_p10) target bundleno = 4 (0x4), region = 89 }
 0x2c4   :  { %670 = vsyncpa [#allocation6], 1 }
 0x2c5   :  { %672 = vsyncpa [#allocation6 + $0x1], 1 }

</bundles_post_ra>
